<compile_context>
chip_gen: v7x
topology: tpu7x:2x2x1
jax: 0.10.0
libtpu: 0.0.40
codegen_flags: <defaults>
</compile_context>

<pallas_src>
import jax
import jax.numpy as jnp
from jax.experimental import pallas as pl
from jax.experimental.pallas import tpu as pltpu

LANE = 128
SUBLANE = 8
NEG_INF_BIAS = -1e30  # pad-column bias: exp(pad - max) underflows to exactly 0


def _round_up(x, m):
    return (x + m - 1) // m * m


def mlp_kernel(x_ref, w1_ref, b1_ref, w2_ref, b2_ref, w3_ref, b3_ref, o_ref):
    x = x_ref[...]

    # fc1 + ReLU   (MXU matmul, f32 accumulation; bias/ReLU stay f32 — friendly to v5e VPU)
    h1 = jnp.dot(x, w1_ref[...], preferred_element_type=jnp.float32) + b1_ref[...]
    h1 = jnp.maximum(h1, 0.0)

    # fc2 + ReLU
    h2 = jnp.dot(h1, w2_ref[...], preferred_element_type=jnp.float32) + b2_ref[...]
    h2 = jnp.maximum(h2, 0.0)

    # fc3 (lane-padded to a multiple of 128 columns by the wrapper)
    logits = jnp.dot(h2, w3_ref[...], preferred_element_type=jnp.float32) + b3_ref[...]

    # log_softmax over last dim; pad columns contribute exp(-huge)=0 to the sum.
    m = jnp.max(logits, axis=-1, keepdims=True)
    shifted = logits - m
    lse = jnp.log(jnp.sum(jnp.exp(shifted), axis=-1, keepdims=True))
    o_ref[...] = (shifted - lse).astype(o_ref.dtype)


def mlp_forward(x, w1, b1, w2, b2, w3, b3, *, tile_b=256):
    """x: (B, in_features); w*: (in, out) pre-transposed from torch layout; b*: (out,)."""
    B, in_features = x.shape
    neurons = w1.shape[1]
    out_features = w3.shape[1]
    f32 = 4

    # ---- lane-dense padding of the final layer -------------------------------
    out_pad = _round_up(out_features, LANE)
    pad_cols = out_pad - out_features
    if pad_cols:
        w3p = jnp.pad(w3, ((0, 0), (0, pad_cols)))
        b3p = jnp.concatenate([b3, jnp.full((pad_cols,), NEG_INF_BIAS, b3.dtype)])
    else:
        w3p, b3p = w3, b3

    # Biases as (1, N) 2-D tiles so they broadcast cleanly from VMEM.
    b1r = b1.reshape(1, -1)
    b2r = b2.reshape(1, -1)
    b3r = b3p.reshape(1, -1)

    # ---- batch tiling --------------------------------------------------------
    # Per-grid-step overhead ~0.35us -> prefer big tiles; minimum one sublane row-group.
    tile_b = min(tile_b, _round_up(B, SUBLANE))
    b_pad = _round_up(B, tile_b)
    xp = jnp.pad(x, ((0, b_pad - B), (0, 0))) if b_pad != B else x
    grid = (b_pad // tile_b,)

    # TODO(synk): at MXU-scale dims (hidden >= 256), cast x/weights to bf16 before the
    # dots (keep preferred_element_type=f32 and the bias/ReLU/log_softmax math in f32).

    # ---- VMEM budget (v7x: 64 MiB physical, 32 MiB scoped default) -----------
    weight_bytes = f32 * (in_features * neurons + neurons * neurons + neurons * out_pad
                          + 2 * neurons + out_pad)
    tile_bytes = 2 * f32 * (tile_b * in_features + tile_b * out_pad)  # double-buffered
    vmem_needed = int(1.3 * (weight_bytes + tile_bytes))
    vmem_limit = vmem_needed if vmem_needed > (32 << 20) else None

    # ---- advisory cost estimate ---------------------------------------------
    flops = 2 * b_pad * (in_features * neurons + neurons * neurons + neurons * out_pad)
    bytes_accessed = f32 * (b_pad * in_features + b_pad * out_pad) + weight_bytes
    transcendentals = 2 * b_pad * out_pad  # exp + log

    out_padded = pl.pallas_call(
        mlp_kernel,
        out_shape=jax.ShapeDtypeStruct((b_pad, out_pad), jnp.float32),
        grid_spec=pltpu.PrefetchScalarGridSpec(
            num_scalar_prefetch=0,
            grid=grid,
            in_specs=[
                pl.BlockSpec((tile_b, in_features), lambda i: (i, 0)),   # x tile (pipelined)
                pl.BlockSpec((in_features, neurons), lambda i: (0, 0)),  # w1 (resident)
                pl.BlockSpec((1, neurons), lambda i: (0, 0)),            # b1
                pl.BlockSpec((neurons, neurons), lambda i: (0, 0)),      # w2
                pl.BlockSpec((1, neurons), lambda i: (0, 0)),            # b2
                pl.BlockSpec((neurons, out_pad), lambda i: (0, 0)),      # w3 (lane-padded)
                pl.BlockSpec((1, out_pad), lambda i: (0, 0)),            # b3
            ],
            out_specs=pl.BlockSpec((tile_b, out_pad), lambda i: (i, 0)),
        ),
        compiler_params=pltpu.CompilerParams(
            dimension_semantics=("parallel",),   # shard batch tiles across v7x's 2 TCs
            vmem_limit_bytes=vmem_limit,
        ),
        cost_estimate=pl.CostEstimate(
            flops=flops, transcendentals=transcendentals, bytes_accessed=bytes_accessed),
    )(xp, w1, b1r, w2, b2r, w3p, b3r)

    # Slice away batch padding and lane padding.
    return out_padded[:B, :out_features]


def init_linear(key, fan_in, fan_out):
    """PyTorch nn.Linear default init: U(-1/sqrt(fan_in), 1/sqrt(fan_in)); weight returned as (in, out)."""
    kw, kb = jax.random.split(key)
    bound = 1.0 / jnp.sqrt(fan_in)
    w = jax.random.uniform(kw, (fan_in, fan_out), jnp.float32, -bound, bound)
    b = jax.random.uniform(kb, (fan_out,), jnp.float32, -bound, bound)
    return w, b


if __name__ == "__main__":
    batch, in_features, neurons, out_features = 8, 32, 64, 16

    key = jax.random.PRNGKey(0)
    kx, k1, k2, k3 = jax.random.split(key, 4)

    x = jax.random.normal(kx, (batch, in_features), jnp.float32)
    w1, b1 = init_linear(k1, in_features, neurons)
    w2, b2 = init_linear(k2, neurons, neurons)
    w3, b3 = init_linear(k3, neurons, out_features)

    out = mlp_forward(x, w1, b1, w2, b2, w3, b3)
    jax.block_until_ready(out)

    # Reference check in plain JAX.
    def ref(x):
        h = jnp.maximum(x @ w1 + b1, 0.0)
        h = jnp.maximum(h @ w2 + b2, 0.0)
        z = h @ w3 + b3
        return jax.nn.log_softmax(z, axis=-1)

    assert out.shape == (batch, out_features), f"bad shape {out.shape}"
    assert jnp.allclose(out, ref(x), atol=1e-5), "mismatch vs reference"
    print("KERNEL_OK")
</pallas_src>

<mosaic_0001>
module attributes {stable_mosaic.version = 11 : i64} {
  func.func @mlp_kernel(%arg0: i32, %arg1: memref<8x32xf32, #tpu.memory_space<vmem>>, %arg2: memref<32x64xf32, #tpu.memory_space<vmem>>, %arg3: memref<1x64xf32, #tpu.memory_space<vmem>>, %arg4: memref<64x64xf32, #tpu.memory_space<vmem>>, %arg5: memref<1x64xf32, #tpu.memory_space<vmem>>, %arg6: memref<64x128xf32, #tpu.memory_space<vmem>>, %arg7: memref<1x128xf32, #tpu.memory_space<vmem>>, %arg8: memref<8x128xf32, #tpu.memory_space<vmem>>) attributes {dimension_semantics = [#tpu.dimension_semantics<parallel>], iteration_bounds = array<i64: 1>, scalar_prefetch = 0 : i64, scratch_operands = 0 : i64, tpu.core_type = #tpu.core_type<tc>, window_params = [{transform_indices = @transform_0, window_bounds = array<i64: 8, 32>}, {pipeline_mode = #tpu.pipeline_mode<synchronous>, transform_indices = @transform_1, window_bounds = array<i64: 32, 64>}, {pipeline_mode = #tpu.pipeline_mode<synchronous>, transform_indices = @transform_2, window_bounds = array<i64: 1, 64>}, {pipeline_mode = #tpu.pipeline_mode<synchronous>, transform_indices = @transform_3, window_bounds = array<i64: 64, 64>}, {pipeline_mode = #tpu.pipeline_mode<synchronous>, transform_indices = @transform_4, window_bounds = array<i64: 1, 64>}, {pipeline_mode = #tpu.pipeline_mode<synchronous>, transform_indices = @transform_5, window_bounds = array<i64: 64, 128>}, {pipeline_mode = #tpu.pipeline_mode<synchronous>, transform_indices = @transform_6, window_bounds = array<i64: 1, 128>}, {transform_indices = @transform_7, window_bounds = array<i64: 8, 128>}]} {
    %c0 = arith.constant 0 : index
    %c0_0 = arith.constant 0 : index
    %0 = vector.load %arg1[%c0, %c0_0] : memref<8x32xf32, #tpu.memory_space<vmem>>, vector<8x32xf32>
    %c0_1 = arith.constant 0 : index
    %c0_2 = arith.constant 0 : index
    %1 = vector.load %arg2[%c0_1, %c0_2] : memref<32x64xf32, #tpu.memory_space<vmem>>, vector<32x64xf32>
    %cst = arith.constant dense<0.000000e+00> : vector<8x64xf32>
    %2 = tpu.matmul %0, %1, %cst {dimension_numbers = #tpu.dot_dimension_numbers<[1], [0], [0], [1], [0, 0, 1, 1], [], []>} : vector<8x32xf32>, vector<32x64xf32>, vector<8x64xf32> -> vector<8x64xf32>
    %c0_3 = arith.constant 0 : index
    %c0_4 = arith.constant 0 : index
    %3 = vector.load %arg3[%c0_3, %c0_4] : memref<1x64xf32, #tpu.memory_space<vmem>>, vector<1x64xf32>
    %4 = vector.broadcast %3 : vector<1x64xf32> to vector<8x64xf32>
    %5 = arith.addf %2, %4 : vector<8x64xf32>
    %cst_5 = arith.constant 0.000000e+00 : f32
    %6 = vector.broadcast %cst_5 : f32 to vector<8x64xf32>
    %7 = arith.maximumf %5, %6 : vector<8x64xf32>
    %c0_6 = arith.constant 0 : index
    %c0_7 = arith.constant 0 : index
    %8 = vector.load %arg4[%c0_6, %c0_7] : memref<64x64xf32, #tpu.memory_space<vmem>>, vector<64x64xf32>
    %cst_8 = arith.constant dense<0.000000e+00> : vector<8x64xf32>
    %9 = tpu.matmul %7, %8, %cst_8 {dimension_numbers = #tpu.dot_dimension_numbers<[1], [0], [0], [1], [0, 0, 1, 1], [], []>} : vector<8x64xf32>, vector<64x64xf32>, vector<8x64xf32> -> vector<8x64xf32>
    %c0_9 = arith.constant 0 : index
    %c0_10 = arith.constant 0 : index
    %10 = vector.load %arg5[%c0_9, %c0_10] : memref<1x64xf32, #tpu.memory_space<vmem>>, vector<1x64xf32>
    %11 = vector.broadcast %10 : vector<1x64xf32> to vector<8x64xf32>
    %12 = arith.addf %9, %11 : vector<8x64xf32>
    %cst_11 = arith.constant 0.000000e+00 : f32
    %13 = vector.broadcast %cst_11 : f32 to vector<8x64xf32>
    %14 = arith.maximumf %12, %13 : vector<8x64xf32>
    %c0_12 = arith.constant 0 : index
    %c0_13 = arith.constant 0 : index
    %15 = vector.load %arg6[%c0_12, %c0_13] : memref<64x128xf32, #tpu.memory_space<vmem>>, vector<64x128xf32>
    %cst_14 = arith.constant dense<0.000000e+00> : vector<8x128xf32>
    %16 = tpu.matmul %14, %15, %cst_14 {dimension_numbers = #tpu.dot_dimension_numbers<[1], [0], [0], [1], [0, 0, 1, 1], [], []>} : vector<8x64xf32>, vector<64x128xf32>, vector<8x128xf32> -> vector<8x128xf32>
    %c0_15 = arith.constant 0 : index
    %c0_16 = arith.constant 0 : index
    %17 = vector.load %arg7[%c0_15, %c0_16] : memref<1x128xf32, #tpu.memory_space<vmem>>, vector<1x128xf32>
    %18 = vector.broadcast %17 : vector<1x128xf32> to vector<8x128xf32>
    %19 = arith.addf %16, %18 : vector<8x128xf32>
    %cst_17 = arith.constant dense<0xFF800000> : vector<8xf32>
    %20 = vector.multi_reduction <maximumf>, %19, %cst_17 [1] : vector<8x128xf32> to vector<8xf32>
    %21 = vector.shape_cast %20 : vector<8xf32> to vector<8x1xf32>
    %22 = vector.broadcast %21 : vector<8x1xf32> to vector<8x128xf32>
    %23 = arith.subf %19, %22 : vector<8x128xf32>
    %24 = math.exp %23 : vector<8x128xf32>
    %cst_18 = arith.constant dense<0.000000e+00> : vector<8xf32>
    %25 = vector.multi_reduction <add>, %24, %cst_18 [1] : vector<8x128xf32> to vector<8xf32>
    %26 = vector.shape_cast %25 : vector<8xf32> to vector<8x1xf32>
    %27 = math.log %26 : vector<8x1xf32>
    %28 = vector.broadcast %27 : vector<8x1xf32> to vector<8x128xf32>
    %29 = arith.subf %23, %28 : vector<8x128xf32>
    %c0_19 = arith.constant 0 : index
    %c0_20 = arith.constant 0 : index
    %30 = vector.load %arg8[%c0_19, %c0_20] : memref<8x128xf32, #tpu.memory_space<vmem>>, vector<8x128xf32>
    tpu.vector_store %arg8[%c0_19, %c0_20], %29 {strides = array<i32>} : memref<8x128xf32, #tpu.memory_space<vmem>>, vector<8x128xf32>,
    return
  }
  func.func @transform_0(%arg0: i32) -> (i32, i32) {
    %c0_i32 = arith.constant 0 : i32
    %c0_i32_0 = arith.constant 0 : i32
    return %arg0, %c0_i32 : i32, i32
  }
  func.func @transform_1(%arg0: i32) -> (i32, i32) {
    %c0_i32 = arith.constant 0 : i32
    %c0_i32_0 = arith.constant 0 : i32
    %c0_i32_1 = arith.constant 0 : i32
    return %c0_i32, %c0_i32_0 : i32, i32
  }
  func.func @transform_2(%arg0: i32) -> (i32, i32) {
    %c0_i32 = arith.constant 0 : i32
    %c0_i32_0 = arith.constant 0 : i32
    %c0_i32_1 = arith.constant 0 : i32
    return %c0_i32, %c0_i32_0 : i32, i32
  }
  func.func @transform_3(%arg0: i32) -> (i32, i32) {
    %c0_i32 = arith.constant 0 : i32
    %c0_i32_0 = arith.constant 0 : i32
    %c0_i32_1 = arith.constant 0 : i32
    return %c0_i32, %c0_i32_0 : i32, i32
  }
  func.func @transform_4(%arg0: i32) -> (i32, i32) {
    %c0_i32 = arith.constant 0 : i32
    %c0_i32_0 = arith.constant 0 : i32
    %c0_i32_1 = arith.constant 0 : i32
    return %c0_i32, %c0_i32_0 : i32, i32
  }
  func.func @transform_5(%arg0: i32) -> (i32, i32) {
    %c0_i32 = arith.constant 0 : i32
    %c0_i32_0 = arith.constant 0 : i32
    %c0_i32_1 = arith.constant 0 : i32
    return %c0_i32, %c0_i32_0 : i32, i32
  }
  func.func @transform_6(%arg0: i32) -> (i32, i32) {
    %c0_i32 = arith.constant 0 : i32
    %c0_i32_0 = arith.constant 0 : i32
    %c0_i32_1 = arith.constant 0 : i32
    return %c0_i32, %c0_i32_0 : i32, i32
  }
  func.func @transform_7(%arg0: i32) -> (i32, i32) {
    %c0_i32 = arith.constant 0 : i32
    %c0_i32_0 = arith.constant 0 : i32
    return %arg0, %c0_i32 : i32, i32
  }
}

</mosaic_0001>

<bundles_post_ra>
// kernel: tpu_custom_call.1
= control target key start
LH: loop header
LB: loop body
LE: loop exit
PB: predicated region body
PF: predicated region fallthrough
CT: control target
= control target key end

     0   :  { %12 = vsyncpa [#allocation3], 0  ;;  %s744_s0 = inlined_call_operand.hbm [shape: f32[8,32], index: 0, kind: input, shape index: {}]   ;;  %s745_s1 = inlined_call_operand.hbm [shape: f32[32,64], index: 1, kind: input, shape index: {}]   ;;  %s746_s2 = inlined_call_operand.vmem [shape: f32[1,64], index: 2, kind: input, shape index: {}]   ;;  %s747_s3 = inlined_call_operand.hbm [shape: f32[64,64], index: 3, kind: input, shape index: {}]   ;;  %s748_s4 = inlined_call_operand.vmem [shape: f32[1,64], index: 4, kind: input, shape index: {}]   ;;  %s749_s5 = inlined_call_operand.hbm [shape: f32[64,128], index: 5, kind: input, shape index: {}]   ;;  %s750_s6 = inlined_call_operand.vmem [shape: f32[1,128], index: 6, kind: input, shape index: {}]   ;;  %s751_s7 = inlined_call_operand.hbm [shape: f32[8,128], index: 7, kind: output, shape index: {}]  }
   0x1   :  { %13 = vsyncpa [#allocation6], 0 }
   0x2   :  { %14 = vsyncpa [#allocation9], 0 }
   0x3   :  { %15 = vsyncpa [#allocation4], 0  ;;  %s613_s24 = smov [#allocation5]   ;;  %s495_s28 = scalar_lea.hbm %s745_s1, 512 }
   0x4   :  { %s31_s25 = sshll.u32 %s613_s24, 4  ;;  %p496_p0 = scmp.ne.s32.totalorder %s745_s1, %s495_s28  ;;  %s32_s25 = int_to_ptr.vmem [resolvable:$true] %s31_s25 }
   0x5   :  { %p499_p1 = scmp.lt.u32.totalorder %s495_s28, %s745_s1 }
   0x7   :  { %p501_p2 = pnand %p499_p1, %p496_p0 }
   0x9   :  { %504 = shalt.err (!%p501_p2)
}
   0xa   :  { %s505_s10 = scalar_lea.vmem %s32_s25, 512  ;;  %p510_p4 = scmp.lt.s32.totalorder %s32_s25, %s32_s25 }
   0xb   :  { %p506_p3 = scmp.ne.s32.totalorder %s32_s25, %s505_s10  ;;  %p511_p5 = scmp.lt.s32.totalorder %s505_s10, %s505_s10 }
   0xd   :  { %p512_p6 = por %p511_p5, %p510_p4 }
   0xf   :  { %p513_p7 = pnand %p512_p6, %p506_p3 }
  0x11   :  { %516 = shalt.err (!%p513_p7)
}
  0x12   :  { %s614_s11 = smov 128   ;;  %s615_s12 = smov 8  }
  0x13   :  { %37 = dma.hbm_to_vmem [thread:$0]  %s745_s1, 512, %s32_s25, [#allocation6], %s614_s11, %s614_s11, %s615_s12  }
  0x14   :  { %s616_s15 = smov [#allocation2]   ;;  %s617_s17 = smov [#allocation7]  }
  0x15   :  { %s22_s16 = sshll.u32 %s616_s15, 4  ;;  %s45_s18 = sshll.u32 %s617_s17, 4  ;;  %s23_s16 = int_to_ptr.vmem [resolvable:$true] %s22_s16  ;;  %s46_s18 = int_to_ptr.vmem [resolvable:$true] %s45_s18 }
  0x16   :  { %s517_s21 = scalar_lea.hbm %s744_s0, 128 }
  0x17   :  { %p518_p8 = scmp.ne.s32.totalorder %s744_s0, %s517_s21  ;;  %p521_p9 = scmp.lt.u32.totalorder %s517_s21, %s744_s0 }
  0x19   :  { %p523_p10 = pnand %p521_p9, %p518_p8 }
  0x1b   :  { %526 = shalt.err (!%p523_p10)
}
  0x1c   :  { %s527_s1 = scalar_lea.vmem %s23_s16, 128  ;;  %p532_p12 = scmp.lt.s32.totalorder %s23_s16, %s23_s16 }
  0x1d   :  { %p528_p11 = scmp.ne.s32.totalorder %s23_s16, %s527_s1  ;;  %p533_p13 = scmp.lt.s32.totalorder %s527_s1, %s527_s1 }
  0x1f   :  { %p534_p0 = por %p533_p13, %p532_p12 }
  0x21   :  { %p535_p1 = pnand %p534_p0, %p528_p11 }
  0x23   :  { %538 = shalt.err (!%p535_p1)
}
  0x24   :  { %25 = dma.hbm_to_vmem [thread:$0]  %s744_s0, 128, %s23_s16, [#allocation3]  }
  0x25   :  { %s539_s30 = scalar_lea.hbm %s747_s3, 1024 }
  0x26   :  { %p540_p2 = scmp.ne.s32.totalorder %s747_s3, %s539_s30  ;;  %p543_p3 = scmp.lt.u32.totalorder %s539_s30, %s747_s3 }
  0x28   :  { %p545_p4 = pnand %p543_p3, %p540_p2 }
  0x2a   :  { %548 = shalt.err (!%p545_p4)
}
  0x2b   :  { %s549_s14 = scalar_lea.vmem %s46_s18, 1024  ;;  %p554_p6 = scmp.lt.s32.totalorder %s46_s18, %s46_s18 }
  0x2c   :  { %p550_p5 = scmp.ne.s32.totalorder %s46_s18, %s549_s14  ;;  %p555_p7 = scmp.lt.s32.totalorder %s549_s14, %s549_s14 }
  0x2e   :  { %p556_p8 = por %p555_p7, %p554_p6 }
  0x30   :  { %p557_p9 = pnand %p556_p8, %p550_p5 }
  0x32   :  { %560 = shalt.err (!%p557_p9)
}
  0x33   :  { %51 = dma.hbm_to_vmem [thread:$0]  %s747_s3, 1024, %s46_s18, [#allocation6], %s614_s11, %s614_s11, %s615_s12  }
  0x34   :  { %s618_s16 = smov [#allocation8]   ;;  %s561_s21 = scalar_lea.hbm %s749_s5, 1024 }
  0x35   :  { %s59_s17 = sshll.u32 %s618_s16, 4  ;;  %p562_p10 = scmp.ne.s32.totalorder %s749_s5, %s561_s21  ;;  %s60_s17 = int_to_ptr.vmem [resolvable:$true] %s59_s17 }
  0x36   :  { %p565_p11 = scmp.lt.u32.totalorder %s561_s21, %s749_s5 }
  0x38   :  { %p567_p12 = pnand %p565_p11, %p562_p10 }
  0x3a   :  { %570 = shalt.err (!%p567_p12)
}
  0x3b   :  { %s571_s1 = scalar_lea.vmem %s60_s17, 1024  ;;  %p576_p0 = scmp.lt.s32.totalorder %s60_s17, %s60_s17 }
  0x3c   :  { %p572_p13 = scmp.ne.s32.totalorder %s60_s17, %s571_s1  ;;  %p577_p1 = scmp.lt.s32.totalorder %s571_s1, %s571_s1 }
  0x3e   :  { %p578_p2 = por %p577_p1, %p576_p0 }
  0x40   :  { %p579_p3 = pnand %p578_p2, %p572_p13 }
  0x42   :  { %582 = shalt.err (!%p579_p3)
}
  0x43   :  { %65 = dma.hbm_to_vmem [thread:$0]  %s749_s5, 1024, %s60_s17, [#allocation9], %s614_s11, %s614_s11, %s615_s12  }
  0x44   :  { %605 = dma.done.wait [#allocation3], 128  }
  0x45   :  { %606 = vsyncadd [#allocation3], 4294967168 }
  0x46   :  { %607 = dma.done.wait [#allocation6], 1536  }
  0x47   :  { %608 = vsyncadd [#allocation6], 4294965760 }
  0x48   :  { %609 = dma.done.wait [#allocation9], 1024  }
  0x49   :  { %610 = vsyncadd [#allocation9], 4294966272  ;;  %v619_v0 = vmov 0.0|0.0   ;;  %vm620_vm0 = vmmov 0   ;;  %v621_v1 = vmov 0.0   ;;  %v81_v2 = vld [vmem:[#allocation5] sm:$0xff] }
  0x4a   :  { %451 = vmatprep.subr.bf16.mxu0 %v619_v0  ;;  %410 = vmatprep.mubr.msk.f32.mxu0 %vm620_vm0, %v621_v1  ;;  %v82_v3 = vld [vmem:[#allocation5 + $0x8] sm:$0xff]  ;;  %v83_v4 = vld [vmem:[#allocation5 + $0x10] sm:$0xff]  ;;  %v84_v6 = vld [vmem:[#allocation5 + $0x18] sm:$0xff]  ;;  %vm92_vm1 = vcmask 261120   ;;  %vm182_vm2 = vcmask 523264  }
  0x4b   :  { %457 = vmatprep.subr.bf16.mxu1 %v619_v0  ;;  %429 = vmatprep.mubr.msk.f32.mxu1 %vm620_vm0, %v621_v1  ;;  %v452_v5 = vpack.c.bf16 %v82_v3, %v81_v2  ;;  %v167_v7 = vld [vmem:[#allocation7] sm:$0xff]  ;;  %v168_v8 = vld [vmem:[#allocation7 + $0x8] sm:$0xff]  ;;  %v169_v9 = vld [vmem:[#allocation7 + $0x10] sm:$0xff]  ;;  %v455_v11 = vpack.c.bf16 %v84_v6, %v83_v4 }
  0x4c   :  { %v170_v10 = vld [vmem:[#allocation7 + $0x18] sm:$0xff]  ;;  %v458_v12 = vpack.c.bf16 %v168_v8, %v167_v7  ;;  %v171_v14 = vld [vmem:[#allocation7 + $0x20] sm:$0xff]  ;;  %v172_v15 = vld [vmem:[#allocation7 + $0x28] sm:$0xff] }
  0x4d   :  { %453 = vmatpush3.bf16.msra.mxu0 %v452_v5  ;;  %v461_v13 = vpack.c.bf16 %v170_v10, %v169_v9  ;;  %v80_v16 = vld [vmem:[#allocation2] sm:$0xff]  ;;  %v464_v17 = vpack.c.bf16 %v172_v15, %v171_v14  ;;  %v173_v18 = vld [vmem:[#allocation7 + $0x30] sm:$0xff]  ;;  %v257_v21 = vld [vmem:[#allocation8] sm:$0xff] }
  0x4e   :  { %454 = vmatprep.subr.bf16.mxu0 %v619_v0  ;;  %459 = vmatpush3.bf16.msra.mxu1 %v458_v12  ;;  %v174_v19 = vld [vmem:[#allocation7 + $0x38] sm:$0xff]  ;;  %v258_v22 = vld [vmem:[#allocation8 + $0x8] sm:$0xff]  ;;  %v259_v23 = vld [vmem:[#allocation8 + $0x10] sm:$0xff] }
  0x4f   :  { %460 = vmatprep.subr.bf16.mxu1 %v619_v0  ;;  %v467_v20 = vpack.c.bf16 %v174_v19, %v173_v18  ;;  %v470_v24 = vpack.c.bf16 %v258_v22, %v257_v21  ;;  %v260_v25 = vld [vmem:[#allocation8 + $0x18] sm:$0xff]  ;;  %v261_v27 = vld [vmem:[#allocation8 + $0x20] sm:$0xff]  ;;  %v262_v28 = vld [vmem:[#allocation8 + $0x28] sm:$0xff] }
  0x50   :  { %v473_v26 = vpack.c.bf16 %v260_v25, %v259_v23  ;;  %v476_v29 = vpack.c.bf16 %v262_v28, %v261_v27  ;;  %v373_v30 = vld [vmem:[%s746_s2] ss:$0 sm:$0xff]  ;;  %v263_v35 = vld [vmem:[#allocation8 + $0x30] sm:$0xff] }
  0x51   :  { %456 = vmatpush3.bf16.msra.mxu0 %v455_v11  ;;  %v264_v36 = vld [vmem:[#allocation8 + $0x38] sm:$0xff] }
  0x52   :  { %469 = vmatprep.subr.bf16.mxu0 %v619_v0  ;;  %462 = vmatpush3.bf16.msra.mxu1 %v461_v13  ;;  %v479_v37 = vpack.c.bf16 %v264_v36, %v263_v35  ;;  %v375_v38 = vld [vmem:[%s748_s4] ss:$0 sm:$0xff]  ;;  %s622_s4 = smov [#allocation10]  }
  0x53   :  { %463 = vmatprep.subr.bf16.mxu1 %v619_v0  ;;  %v377_v43 = vld [vmem:[%s750_s6] ss:$0 sm:$0xff]  ;;  %s362_s28 = sshll.u32 %s622_s4, 4  ;;  %s363_s28 = int_to_ptr.vmem [resolvable:$true] %s362_s28 }
  0x54   :  { %411 = vmatmul.mubr.msk.f32.vlgmr.msra.gmra.mrb[0].mxu0 %vm92_vm1, %v80_v16  ;;  %s583_s6 = scalar_lea.vmem %s363_s28, 128  ;;  %p588_p5 = scmp.lt.s32.totalorder %s363_s28, %s363_s28 }
  0x55   :  { %448 = vmatprep.mubr.msk.f32.mxu0 %vm620_vm0, %v621_v1  ;;  %471 = vmatpush3.bf16.msra.mxu0 %v470_v24  ;;  %p584_p4 = scmp.ne.s32.totalorder %s363_s28, %s583_s6  ;;  %p589_p6 = scmp.lt.s32.totalorder %s583_s6, %s583_s6 }
  0x56   :  { %465 = vmatpush3.bf16.msra.mxu1 %v464_v17  ;;  %472 = vmatprep.subr.bf16.mxu0 %v619_v0 }
  0x57   :  { %466 = vmatprep.subr.bf16.mxu1 %v619_v0  ;;  %p590_p7 = por %p589_p6, %p588_p5 }
  0x59   :  { %474 = vmatpush3.bf16.msra.mxu0 %v473_v26  ;;  %p591_p8 = pnand %p590_p7, %p584_p4 }
  0x5a   :  { %468 = vmatpush3.bf16.msra.mxu1 %v467_v20  ;;  %475 = vmatprep.subr.bf16.mxu0 %v619_v0 }
  0x5d   :  { %477 = vmatpush3.bf16.msra.mxu0 %v476_v29 }
  0x5e   :  { %478 = vmatprep.subr.bf16.mxu0 %v619_v0 }
  0x61   :  { %480 = vmatpush3.bf16.msra.mxu0 %v479_v37 }
 0x127   :  { %v162_v31 = vpop.f32.mrb[0].mxu0 }
 0x128   :  { %v163_v32 = vadd.f32 %v373_v30, %v162_v31  ;;  %v412_v33 = vpop.f32.mrb[1].mxu0 }
 0x12a   :  { %v166_v34 = vmax.f32 %v163_v32, 0.0 }
 0x12c   :  { %430 = vmatmul.mubr.msk.f32.vlgmr.msra.gmra.mrb[0].mxu1 %vm182_vm2, %v166_v34 }
 0x1ff   :  { %v252_v39 = vpop.f32.mrb[0].mxu1 }
 0x200   :  { %v253_v40 = vadd.f32 %v375_v38, %v252_v39  ;;  %v431_v41 = vpop.f32.mrb[1].mxu1 }
 0x202   :  { %v256_v42 = vmax.f32 %v253_v40, 0.0 }
 0x204   :  { %449 = vmatmul.mubr.msk.f32.vlgmr.msra.gmra.mrb[2].mxu0 %vm182_vm2, %v256_v42 }
 0x2d7   :  { %v341_v44 = vpop.f32.mrb[2].mxu0 }
 0x2d8   :  { %v342_v45 = vadd.f32 %v377_v43, %v341_v44  ;;  %v450_v46 = vpop.f32.mrb[3].mxu0 }
 0x2da   :  { %345 = vmax.xlane.f32.xlu0 %v342_v45 }
 0x367   :  { %v346_v47 = vpop.xlane.xlu0 %345 }
 0x368   :  { %v347_v48 = vsub.f32 %v342_v45, %v346_v47 }
 0x36a   :  { %v348_v49 = vmul.f32 1.442695, %v347_v48 }
 0x36c   :  { %491 = vpow2.f32 %v348_v49 }
 0x376   :  { %v492_v50 = vpop.eup %491 }
 0x377   :  { %350 = vadd.xlane.f32.xlu0 %v492_v50 }
 0x404   :  { %v351_v51 = vpop.xlane.xlu0 %350 }
 0x405   :  { %493 = vlog2.f32 %v351_v51 }
 0x40f   :  { %v494_v52 = vpop.eup %493 }
 0x410   :  { %v353_v53 = vmul.f32 0.6931472, %v494_v52 }
 0x412   :  { %v354_v54 = vsub.f32 %v347_v48, %v353_v53 }
 0x414   :  { %355 = vst [vmem:[#allocation10] sm:$0xff] %v354_v54 }
 0x415   :  { %594 = shalt.err (!%p591_p8)
}
 0x416   :  { %s595_s8 = scalar_lea.hbm %s751_s7, 128 }
 0x417   :  { %p596_p9 = scmp.ne.s32.totalorder %s751_s7, %s595_s8  ;;  %p599_p10 = scmp.lt.u32.totalorder %s595_s8, %s751_s7 }
 0x419   :  { %p601_p11 = pnand %p599_p10, %p596_p9 }
 0x41b   :  { %604 = shalt.err (!%p601_p11)
}
 0x41c   :  { %365 = dma.vmem_to_hbm [thread:$0]  %s363_s28, 128, %s751_s7, [#allocation4]  }
 0x41d   :  { %611 = dma.done.wait [#allocation4], 128  }
 0x41e   :  { %612 = vsyncadd [#allocation4], 4294967168 }
 0x41f   :  { %369 = vsyncpa [#allocation3], 1 }
 0x420   :  { %370 = vsyncpa [#allocation6], 1 }
 0x421   :  { %371 = vsyncpa [#allocation9], 1 }
 0x422   :  { %372 = vsyncpa [#allocation4], 1 }

</bundles_post_ra>
